<compile_context>
chip_gen: v5e
topology: v5e:2x2
jax: 0.10.0
libtpu: 0.0.40
codegen_flags: <defaults>
</compile_context>

<pallas_src>
import functools

import jax
import jax.numpy as jnp
from jax.experimental import pallas as pl
from jax.experimental.pallas import tpu as pltpu


def basic_block_kernel(xc1_ref, wcomb_ref, w2b_ref, svert_ref, pool_ref,
                       bnp_ref, rw_ref, o_ref, *, NH, WC, eps):
    pool = pool_ref[...]        # (WC, WC): per-channel averaging over (rows, w)
    bnp = bnp_ref[...]          # (6, WC):  lane-tiled gamma/beta for the 3 BNs

    def batchnorm(y, row):
        # training-mode BN; stats come out already tiled across the (w,c) lanes
        g = bnp[row:row + 1, :]
        b = bnp[row + 1:row + 2, :]
        mean_t = jnp.sum(jnp.dot(y, pool, preferred_element_type=jnp.float32),
                         axis=0, keepdims=True)                      # (1, WC)
        d = y - mean_t
        var_t = jnp.sum(jnp.dot(d * d, pool, preferred_element_type=jnp.float32),
                        axis=0, keepdims=True)                       # (1, WC)
        return d * jax.lax.rsqrt(var_t + eps) * g + b

    # ---- conv1 + shortcut 1x1 conv: a single im2col matmul -> (NH, 2*WC) ----
    z = jnp.dot(xc1_ref[...], wcomb_ref[...],
                preferred_element_type=jnp.float32)
    z1 = z[:, :WC]              # conv1 output     (NH, WC), lane-dense
    zs = z[:, WC:]              # shortcut output  (NH, WC), lane-dense

    # ---- bn1 + relu -----------------------------------------------------------
    y = jnp.maximum(batchnorm(z1, 0), 0.0)                            # (NH, WC)

    # ---- conv2: vertical shift matmul + one banded matmul ---------------------
    yv = jnp.dot(svert_ref[...], y, preferred_element_type=jnp.float32)  # (2*NH, WC)
    y3 = jnp.concatenate([yv[:NH], y, yv[NH:]], axis=1)               # (NH, 3*WC)
    z2 = jnp.dot(y3, w2b_ref[...], preferred_element_type=jnp.float32)    # (NH, WC)

    # ---- bn2, shortcut bn, rezero residual; lane-dense (NH, WC) store ---------
    out2 = batchnorm(z2, 2)
    sc = batchnorm(zs, 4)
    o_ref[...] = sc + rw_ref[...] * jnp.maximum(out2, 0.0)


def basic_block_forward(x_nchw, params, eps=1e-5):
    N, Cin, H, W = x_nchw.shape
    Cout = params["w1"].shape[-1]
    Wp = W + 2
    NH, WC = N * H, W * Cout
    K1 = 3 * Wp * Cin
    f32 = jnp.float32
    hi = jax.lax.Precision.HIGHEST

    x_nhwc = jnp.transpose(x_nchw, (0, 2, 3, 1)).astype(f32)

    # -- glue: row-wise im2col of the zero-padded input -> (NH, 3*Wp*Cin) -------
    xp = jnp.pad(x_nhwc, ((0, 0), (1, 1), (1, 1), (0, 0)))    # (N, H+2, W+2, Cin)
    xc1 = jnp.concatenate(
        [xp[:, kh:kh + H].reshape(NH, Wp * Cin) for kh in range(3)], axis=1)

    # -- glue: banded weights so each conv is one lane-dense matmul -------------
    w1, w2, ws = params["w1"], params["w2"], params["ws"]
    band1 = (jnp.arange(Wp)[None, :, None]
             == jnp.arange(W)[None, None, :] + jnp.arange(3)[:, None, None]
             ).astype(f32)                                    # (3,Wp,W): w_in == w_out+kw
    wc1 = jnp.einsum("kpw,hkio->hpiwo", band1, w1, precision=hi).reshape(K1, WC)
    wsc = jnp.einsum("h,pw,io->hpiwo", jnp.array([0.0, 1.0, 0.0], f32),
                     band1[1], ws, precision=hi).reshape(K1, WC)   # centre tap only
    wcomb = jnp.concatenate([wc1, wsc], axis=1)               # (K1, 2*WC)

    band2 = (jnp.arange(W)[None, :, None]
             == jnp.arange(W)[None, None, :] + jnp.arange(3)[:, None, None] - 1
             ).astype(f32)                                    # (3,W,W): w_in == w_out+kw-1
    w2b = jnp.einsum("kpw,hkio->hpiwo", band2, w2, precision=hi).reshape(3 * WC, WC)

    # -- glue: vertical-shift matrices (zero rows at per-image h boundaries) ----
    r = jnp.arange(NH)
    h_of_r = r % H
    s_prev = ((r[:, None] - 1 == r[None, :]) & (h_of_r[:, None] != 0)).astype(f32)
    s_next = ((r[:, None] + 1 == r[None, :]) & (h_of_r[:, None] != H - 1)).astype(f32)
    svert = jnp.concatenate([s_prev, s_next], axis=0)         # (2*NH, NH)

    # -- glue: per-channel pooling matrix + lane-tiled BN affine params ---------
    ch = jnp.arange(WC) % Cout
    pool = (ch[:, None] == ch[None, :]).astype(f32) / float(N * H * W)
    bnp = jnp.concatenate(
        [jnp.tile(params[k], (1, W)) for k in ("g1", "b1", "g2", "b2", "gs", "bs")],
        axis=0)                                               # (6, WC)

    def vmem(shape):
        return pl.BlockSpec(shape, lambda i, _s=shape: (0,) * len(_s))

    kernel = functools.partial(basic_block_kernel, NH=NH, WC=WC, eps=eps)

    out2d = pl.pallas_call(
        kernel,
        out_shape=jax.ShapeDtypeStruct((NH, WC), f32),
        grid=(1,),
        in_specs=[
            vmem((NH, K1)),          # im2col'd input rows
            vmem((K1, 2 * WC)),      # conv1 + shortcut banded weight
            vmem((3 * WC, WC)),      # conv2 banded weight
            vmem((2 * NH, NH)),      # vertical shift matrices
            vmem((WC, WC)),          # per-channel pooling matrix (BN stats)
            vmem((6, WC)),           # lane-tiled BN gamma/beta (bn1, bn2, bn_s)
            vmem((1, 1)),            # res_weight
        ],
        out_specs=vmem((NH, WC)),
        compiler_params=pltpu.CompilerParams(
            dimension_semantics=("arbitrary",),
            vmem_limit_bytes=32 * 1024 * 1024),
    )(xc1, wcomb, w2b, svert, pool, bnp, params["rw"])

    return jnp.transpose(out2d.reshape(N, H, W, Cout), (0, 3, 1, 2))


def basic_block_reference(x_nchw, params, eps=1e-5):
    """Pure-JAX reference mirroring the PyTorch forward (training-mode BN)."""
    def conv(x, w, pad):
        return jax.lax.conv_general_dilated(
            x, w, window_strides=(1, 1), padding=pad,
            dimension_numbers=("NCHW", "HWIO", "NCHW"),
            precision=jax.lax.Precision.HIGHEST)

    def bn(x, g, b):
        m = jnp.mean(x, axis=(0, 2, 3), keepdims=True)
        v = jnp.var(x, axis=(0, 2, 3), keepdims=True)
        return (x - m) * jax.lax.rsqrt(v + eps) * g.reshape(1, -1, 1, 1) \
            + b.reshape(1, -1, 1, 1)

    out = jax.nn.relu(bn(conv(x_nchw, params["w1"], ((1, 1), (1, 1))),
                         params["g1"], params["b1"]))
    out = bn(conv(out, params["w2"], ((1, 1), (1, 1))),
             params["g2"], params["b2"])
    ws_1x1 = params["ws"].reshape(1, 1, *params["ws"].shape)
    sc = bn(conv(x_nchw, ws_1x1, ((0, 0), (0, 0))),
            params["gs"], params["bs"])
    return sc + params["rw"].reshape(()) * jax.nn.relu(out)


if __name__ == "__main__":
    N, Cin, H, W = 2, 4, 16, 16
    Cout = 8  # planes

    key = jax.random.PRNGKey(0)
    keys = jax.random.split(key, 10)

    params = {
        # conv weights stored as HWIO
        "w1": (0.1 * jax.random.normal(keys[0], (3, 3, Cin, Cout))).astype(jnp.float32),
        "w2": (0.1 * jax.random.normal(keys[1], (3, 3, Cout, Cout))).astype(jnp.float32),
        "ws": (0.1 * jax.random.normal(keys[2], (Cin, Cout))).astype(jnp.float32),
        # batchnorm affine params (deterministic, non-trivial)
        "g1": (1.0 + 0.1 * jax.random.normal(keys[3], (1, Cout))).astype(jnp.float32),
        "b1": (0.1 * jax.random.normal(keys[4], (1, Cout))).astype(jnp.float32),
        "g2": (1.0 + 0.1 * jax.random.normal(keys[5], (1, Cout))).astype(jnp.float32),
        "b2": (0.1 * jax.random.normal(keys[6], (1, Cout))).astype(jnp.float32),
        "gs": (1.0 + 0.1 * jax.random.normal(keys[7], (1, Cout))).astype(jnp.float32),
        "bs": (0.1 * jax.random.normal(keys[8], (1, Cout))).astype(jnp.float32),
        # PyTorch initializes res_weight to 0; use 0.25 so the residual branch
        # actually contributes to the output of this synthetic test.
        "rw": jnp.full((1, 1), 0.25, jnp.float32),
    }

    x = jax.random.normal(keys[9], (N, Cin, H, W), dtype=jnp.float32)

    fwd = jax.jit(basic_block_forward)
    out = jax.block_until_ready(fwd(x, params))

    ref = basic_block_reference(x, params)
    assert out.shape == (N, Cout, H, W), out.shape
    assert jnp.allclose(out, ref, atol=2e-3, rtol=2e-3), \
        float(jnp.max(jnp.abs(out - ref)))

    print("KERNEL_OK")
</pallas_src>

<mosaic_0001>
module attributes {stable_mosaic.version = 11 : i64} {
  func.func @basic_block_kernel(%arg0: i32, %arg1: memref<32x216xf32, #tpu.memory_space<vmem>>, %arg2: memref<216x256xf32, #tpu.memory_space<vmem>>, %arg3: memref<384x128xf32, #tpu.memory_space<vmem>>, %arg4: memref<64x32xf32, #tpu.memory_space<vmem>>, %arg5: memref<128x128xf32, #tpu.memory_space<vmem>>, %arg6: memref<6x128xf32, #tpu.memory_space<vmem>>, %arg7: memref<1x1xf32, #tpu.memory_space<vmem>>, %arg8: memref<32x128xf32, #tpu.memory_space<vmem>>) attributes {dimension_semantics = [#tpu.dimension_semantics<arbitrary>], iteration_bounds = array<i64: 1>, scalar_prefetch = 0 : i64, scratch_operands = 0 : i64, tpu.core_type = #tpu.core_type<tc>, window_params = [{pipeline_mode = #tpu.pipeline_mode<synchronous>, transform_indices = @transform_0, window_bounds = array<i64: 32, 216>}, {pipeline_mode = #tpu.pipeline_mode<synchronous>, transform_indices = @transform_1, window_bounds = array<i64: 216, 256>}, {pipeline_mode = #tpu.pipeline_mode<synchronous>, transform_indices = @transform_2, window_bounds = array<i64: 384, 128>}, {pipeline_mode = #tpu.pipeline_mode<synchronous>, transform_indices = @transform_3, window_bounds = array<i64: 64, 32>}, {pipeline_mode = #tpu.pipeline_mode<synchronous>, transform_indices = @transform_4, window_bounds = array<i64: 128, 128>}, {pipeline_mode = #tpu.pipeline_mode<synchronous>, transform_indices = @transform_5, window_bounds = array<i64: 6, 128>}, {pipeline_mode = #tpu.pipeline_mode<synchronous>, transform_indices = @transform_6, window_bounds = array<i64: 1, 1>}, {pipeline_mode = #tpu.pipeline_mode<synchronous>, transform_indices = @transform_7, window_bounds = array<i64: 32, 128>}]} {
    %c0 = arith.constant 0 : index
    %c0_0 = arith.constant 0 : index
    %0 = vector.load %arg5[%c0, %c0_0] : memref<128x128xf32, #tpu.memory_space<vmem>>, vector<128x128xf32>
    %c0_1 = arith.constant 0 : index
    %c0_2 = arith.constant 0 : index
    %1 = vector.load %arg6[%c0_1, %c0_2] : memref<6x128xf32, #tpu.memory_space<vmem>>, vector<6x128xf32>
    %c0_3 = arith.constant 0 : index
    %c0_4 = arith.constant 0 : index
    %2 = vector.load %arg1[%c0_3, %c0_4] : memref<32x216xf32, #tpu.memory_space<vmem>>, vector<32x216xf32>
    %c0_5 = arith.constant 0 : index
    %c0_6 = arith.constant 0 : index
    %3 = vector.load %arg2[%c0_5, %c0_6] : memref<216x256xf32, #tpu.memory_space<vmem>>, vector<216x256xf32>
    %cst = arith.constant dense<0.000000e+00> : vector<32x256xf32>
    %4 = tpu.matmul %2, %3, %cst {dimension_numbers = #tpu.dot_dimension_numbers<[1], [0], [0], [1], [0, 0, 1, 1], [], []>} : vector<32x216xf32>, vector<216x256xf32>, vector<32x256xf32> -> vector<32x256xf32>
    %5 = vector.extract_strided_slice %4 {offsets = [0, 0], sizes = [32, 128], strides = [1, 1]} : vector<32x256xf32> to vector<32x128xf32>
    %6 = vector.extract_strided_slice %4 {offsets = [0, 128], sizes = [32, 128], strides = [1, 1]} : vector<32x256xf32> to vector<32x128xf32>
    %7 = vector.extract_strided_slice %1 {offsets = [0, 0], sizes = [1, 128], strides = [1, 1]} : vector<6x128xf32> to vector<1x128xf32>
    %8 = vector.extract_strided_slice %1 {offsets = [1, 0], sizes = [1, 128], strides = [1, 1]} : vector<6x128xf32> to vector<1x128xf32>
    %cst_7 = arith.constant dense<0.000000e+00> : vector<32x128xf32>
    %9 = tpu.matmul %5, %0, %cst_7 {dimension_numbers = #tpu.dot_dimension_numbers<[1], [0], [0], [1], [0, 0, 1, 1], [], []>} : vector<32x128xf32>, vector<128x128xf32>, vector<32x128xf32> -> vector<32x128xf32>
    %cst_8 = arith.constant dense<0.000000e+00> : vector<128xf32>
    %10 = vector.multi_reduction <add>, %9, %cst_8 [0] : vector<32x128xf32> to vector<128xf32>
    %11 = vector.shape_cast %10 : vector<128xf32> to vector<1x128xf32>
    %12 = vector.broadcast %11 : vector<1x128xf32> to vector<32x128xf32>
    %13 = arith.subf %5, %12 : vector<32x128xf32>
    %14 = arith.mulf %13, %13 : vector<32x128xf32>
    %cst_9 = arith.constant dense<0.000000e+00> : vector<32x128xf32>
    %15 = tpu.matmul %14, %0, %cst_9 {dimension_numbers = #tpu.dot_dimension_numbers<[1], [0], [0], [1], [0, 0, 1, 1], [], []>} : vector<32x128xf32>, vector<128x128xf32>, vector<32x128xf32> -> vector<32x128xf32>
    %cst_10 = arith.constant dense<0.000000e+00> : vector<128xf32>
    %16 = vector.multi_reduction <add>, %15, %cst_10 [0] : vector<32x128xf32> to vector<128xf32>
    %17 = vector.shape_cast %16 : vector<128xf32> to vector<1x128xf32>
    %cst_11 = arith.constant 9.99999974E-6 : f32
    %18 = vector.broadcast %cst_11 : f32 to vector<1x128xf32>
    %19 = arith.addf %17, %18 : vector<1x128xf32>
    %20 = math.rsqrt %19 : vector<1x128xf32>
    %21 = vector.broadcast %20 : vector<1x128xf32> to vector<32x128xf32>
    %22 = arith.mulf %13, %21 : vector<32x128xf32>
    %23 = vector.broadcast %7 : vector<1x128xf32> to vector<32x128xf32>
    %24 = arith.mulf %22, %23 : vector<32x128xf32>
    %25 = vector.broadcast %8 : vector<1x128xf32> to vector<32x128xf32>
    %26 = arith.addf %24, %25 : vector<32x128xf32>
    %cst_12 = arith.constant 0.000000e+00 : f32
    %27 = vector.broadcast %cst_12 : f32 to vector<32x128xf32>
    %28 = arith.maximumf %26, %27 : vector<32x128xf32>
    %c0_13 = arith.constant 0 : index
    %c0_14 = arith.constant 0 : index
    %29 = vector.load %arg4[%c0_13, %c0_14] : memref<64x32xf32, #tpu.memory_space<vmem>>, vector<64x32xf32>
    %cst_15 = arith.constant dense<0.000000e+00> : vector<64x128xf32>
    %30 = tpu.matmul %29, %28, %cst_15 {dimension_numbers = #tpu.dot_dimension_numbers<[1], [0], [0], [1], [0, 0, 1, 1], [], []>} : vector<64x32xf32>, vector<32x128xf32>, vector<64x128xf32> -> vector<64x128xf32>
    %31 = vector.extract_strided_slice %30 {offsets = [0, 0], sizes = [32, 128], strides = [1, 1]} : vector<64x128xf32> to vector<32x128xf32>
    %32 = vector.extract_strided_slice %30 {offsets = [32, 0], sizes = [32, 128], strides = [1, 1]} : vector<64x128xf32> to vector<32x128xf32>
    %33 = tpu.concatenate %31, %28, %32 in 1 : vector<32x128xf32>, vector<32x128xf32>, vector<32x128xf32> -> vector<32x384xf32>
    %c0_16 = arith.constant 0 : index
    %c0_17 = arith.constant 0 : index
    %34 = vector.load %arg3[%c0_16, %c0_17] : memref<384x128xf32, #tpu.memory_space<vmem>>, vector<384x128xf32>
    %cst_18 = arith.constant dense<0.000000e+00> : vector<32x128xf32>
    %35 = tpu.matmul %33, %34, %cst_18 {dimension_numbers = #tpu.dot_dimension_numbers<[1], [0], [0], [1], [0, 0, 1, 1], [], []>} : vector<32x384xf32>, vector<384x128xf32>, vector<32x128xf32> -> vector<32x128xf32>
    %36 = vector.extract_strided_slice %1 {offsets = [2, 0], sizes = [1, 128], strides = [1, 1]} : vector<6x128xf32> to vector<1x128xf32>
    %37 = vector.extract_strided_slice %1 {offsets = [3, 0], sizes = [1, 128], strides = [1, 1]} : vector<6x128xf32> to vector<1x128xf32>
    %cst_19 = arith.constant dense<0.000000e+00> : vector<32x128xf32>
    %38 = tpu.matmul %35, %0, %cst_19 {dimension_numbers = #tpu.dot_dimension_numbers<[1], [0], [0], [1], [0, 0, 1, 1], [], []>} : vector<32x128xf32>, vector<128x128xf32>, vector<32x128xf32> -> vector<32x128xf32>
    %cst_20 = arith.constant dense<0.000000e+00> : vector<128xf32>
    %39 = vector.multi_reduction <add>, %38, %cst_20 [0] : vector<32x128xf32> to vector<128xf32>
    %40 = vector.shape_cast %39 : vector<128xf32> to vector<1x128xf32>
    %41 = vector.broadcast %40 : vector<1x128xf32> to vector<32x128xf32>
    %42 = arith.subf %35, %41 : vector<32x128xf32>
    %43 = arith.mulf %42, %42 : vector<32x128xf32>
    %cst_21 = arith.constant dense<0.000000e+00> : vector<32x128xf32>
    %44 = tpu.matmul %43, %0, %cst_21 {dimension_numbers = #tpu.dot_dimension_numbers<[1], [0], [0], [1], [0, 0, 1, 1], [], []>} : vector<32x128xf32>, vector<128x128xf32>, vector<32x128xf32> -> vector<32x128xf32>
    %cst_22 = arith.constant dense<0.000000e+00> : vector<128xf32>
    %45 = vector.multi_reduction <add>, %44, %cst_22 [0] : vector<32x128xf32> to vector<128xf32>
    %46 = vector.shape_cast %45 : vector<128xf32> to vector<1x128xf32>
    %cst_23 = arith.constant 9.99999974E-6 : f32
    %47 = vector.broadcast %cst_23 : f32 to vector<1x128xf32>
    %48 = arith.addf %46, %47 : vector<1x128xf32>
    %49 = math.rsqrt %48 : vector<1x128xf32>
    %50 = vector.broadcast %49 : vector<1x128xf32> to vector<32x128xf32>
    %51 = arith.mulf %42, %50 : vector<32x128xf32>
    %52 = vector.broadcast %36 : vector<1x128xf32> to vector<32x128xf32>
    %53 = arith.mulf %51, %52 : vector<32x128xf32>
    %54 = vector.broadcast %37 : vector<1x128xf32> to vector<32x128xf32>
    %55 = arith.addf %53, %54 : vector<32x128xf32>
    %56 = vector.extract_strided_slice %1 {offsets = [4, 0], sizes = [1, 128], strides = [1, 1]} : vector<6x128xf32> to vector<1x128xf32>
    %57 = vector.extract_strided_slice %1 {offsets = [5, 0], sizes = [1, 128], strides = [1, 1]} : vector<6x128xf32> to vector<1x128xf32>
    %cst_24 = arith.constant dense<0.000000e+00> : vector<32x128xf32>
    %58 = tpu.matmul %6, %0, %cst_24 {dimension_numbers = #tpu.dot_dimension_numbers<[1], [0], [0], [1], [0, 0, 1, 1], [], []>} : vector<32x128xf32>, vector<128x128xf32>, vector<32x128xf32> -> vector<32x128xf32>
    %cst_25 = arith.constant dense<0.000000e+00> : vector<128xf32>
    %59 = vector.multi_reduction <add>, %58, %cst_25 [0] : vector<32x128xf32> to vector<128xf32>
    %60 = vector.shape_cast %59 : vector<128xf32> to vector<1x128xf32>
    %61 = vector.broadcast %60 : vector<1x128xf32> to vector<32x128xf32>
    %62 = arith.subf %6, %61 : vector<32x128xf32>
    %63 = arith.mulf %62, %62 : vector<32x128xf32>
    %cst_26 = arith.constant dense<0.000000e+00> : vector<32x128xf32>
    %64 = tpu.matmul %63, %0, %cst_26 {dimension_numbers = #tpu.dot_dimension_numbers<[1], [0], [0], [1], [0, 0, 1, 1], [], []>} : vector<32x128xf32>, vector<128x128xf32>, vector<32x128xf32> -> vector<32x128xf32>
    %cst_27 = arith.constant dense<0.000000e+00> : vector<128xf32>
    %65 = vector.multi_reduction <add>, %64, %cst_27 [0] : vector<32x128xf32> to vector<128xf32>
    %66 = vector.shape_cast %65 : vector<128xf32> to vector<1x128xf32>
    %cst_28 = arith.constant 9.99999974E-6 : f32
    %67 = vector.broadcast %cst_28 : f32 to vector<1x128xf32>
    %68 = arith.addf %66, %67 : vector<1x128xf32>
    %69 = math.rsqrt %68 : vector<1x128xf32>
    %70 = vector.broadcast %69 : vector<1x128xf32> to vector<32x128xf32>
    %71 = arith.mulf %62, %70 : vector<32x128xf32>
    %72 = vector.broadcast %56 : vector<1x128xf32> to vector<32x128xf32>
    %73 = arith.mulf %71, %72 : vector<32x128xf32>
    %74 = vector.broadcast %57 : vector<1x128xf32> to vector<32x128xf32>
    %75 = arith.addf %73, %74 : vector<32x128xf32>
    %c0_29 = arith.constant 0 : index
    %c0_30 = arith.constant 0 : index
    %76 = vector.load %arg7[%c0_29, %c0_30] : memref<1x1xf32, #tpu.memory_space<vmem>>, vector<1x1xf32>
    %cst_31 = arith.constant 0.000000e+00 : f32
    %77 = vector.broadcast %cst_31 : f32 to vector<32x128xf32>
    %78 = arith.maximumf %55, %77 : vector<32x128xf32>
    %79 = vector.broadcast %76 : vector<1x1xf32> to vector<32x128xf32>
    %80 = arith.mulf %79, %78 : vector<32x128xf32>
    %81 = arith.addf %75, %80 : vector<32x128xf32>
    %c0_32 = arith.constant 0 : index
    %c0_33 = arith.constant 0 : index
    %82 = vector.load %arg8[%c0_32, %c0_33] : memref<32x128xf32, #tpu.memory_space<vmem>>, vector<32x128xf32>
    tpu.vector_store %arg8[%c0_32, %c0_33], %81 {strides = array<i32>} : memref<32x128xf32, #tpu.memory_space<vmem>>, vector<32x128xf32>,
    return
  }
  func.func @transform_0(%arg0: i32) -> (i32, i32) {
    %c0_i32 = arith.constant 0 : i32
    %c0_i32_0 = arith.constant 0 : i32
    %c0_i32_1 = arith.constant 0 : i32
    return %c0_i32, %c0_i32_0 : i32, i32
  }
  func.func @transform_1(%arg0: i32) -> (i32, i32) {
    %c0_i32 = arith.constant 0 : i32
    %c0_i32_0 = arith.constant 0 : i32
    %c0_i32_1 = arith.constant 0 : i32
    return %c0_i32, %c0_i32_0 : i32, i32
  }
  func.func @transform_2(%arg0: i32) -> (i32, i32) {
    %c0_i32 = arith.constant 0 : i32
    %c0_i32_0 = arith.constant 0 : i32
    %c0_i32_1 = arith.constant 0 : i32
    return %c0_i32, %c0_i32_0 : i32, i32
  }
  func.func @transform_3(%arg0: i32) -> (i32, i32) {
    %c0_i32 = arith.constant 0 : i32
    %c0_i32_0 = arith.constant 0 : i32
    %c0_i32_1 = arith.constant 0 : i32
    return %c0_i32, %c0_i32_0 : i32, i32
  }
  func.func @transform_4(%arg0: i32) -> (i32, i32) {
    %c0_i32 = arith.constant 0 : i32
    %c0_i32_0 = arith.constant 0 : i32
    %c0_i32_1 = arith.constant 0 : i32
    return %c0_i32, %c0_i32_0 : i32, i32
  }
  func.func @transform_5(%arg0: i32) -> (i32, i32) {
    %c0_i32 = arith.constant 0 : i32
    %c0_i32_0 = arith.constant 0 : i32
    %c0_i32_1 = arith.constant 0 : i32
    return %c0_i32, %c0_i32_0 : i32, i32
  }
  func.func @transform_6(%arg0: i32) -> (i32, i32) {
    %c0_i32 = arith.constant 0 : i32
    %c0_i32_0 = arith.constant 0 : i32
    %c0_i32_1 = arith.constant 0 : i32
    return %c0_i32, %c0_i32_0 : i32, i32
  }
  func.func @transform_7(%arg0: i32) -> (i32, i32) {
    %c0_i32 = arith.constant 0 : i32
    %c0_i32_0 = arith.constant 0 : i32
    %c0_i32_1 = arith.constant 0 : i32
    return %c0_i32, %c0_i32_0 : i32, i32
  }
}

</mosaic_0001>

<bundles_post_ra>
// kernel: basic_block_forward.1
= control target key start
LH: loop header
LB: loop body
LE: loop exit
PB: predicated region body
PF: predicated region fallthrough
CT: control target
= control target key end

     0   :  { %vm107_vm0 = vcmask 719872   ;;  %vm357_vm4 = vcmask 261120   ;;  %s1593_s1 = inlined_call_operand.vmem [shape: f32[216,256], index: 1, kind: input, shape index: {}]   ;;  %s1594_s0 = inlined_call_operand.vmem [shape: f32[32,216], index: 0, kind: input, shape index: {}]   ;;  %s1595_s4 = inlined_call_operand.vmem [shape: f32[128,128], index: 4, kind: input, shape index: {}]   ;;  %s1596_s2 = inlined_call_operand.vmem [shape: f32[384,128], index: 2, kind: input, shape index: {}]   ;;  %s1597_s5 = inlined_call_operand.vmem [shape: f32[6,128], index: 5, kind: input, shape index: {}]   ;;  %s1598_s3 = inlined_call_operand.vmem [shape: f32[64,32], index: 3, kind: input, shape index: {}]   ;;  %s1599_s6 = inlined_call_operand.<no memory space> [shape: f32[1,1], index: 6, kind: input, shape index: {}]   ;;  %s1600_s7 = inlined_call_operand.vmem [shape: f32[32,128], index: 7, kind: output, shape index: {}]  }
   0x1   :  { %v83_v0 = vld [vmem:[%s1593_s1 + $0xf0] sm:$0xff]  ;;  %v81_v1 = vld [vmem:[%s1593_s1 + $0xe0] sm:$0xff]  ;;  %v957_v23 = vld [vmem:[%s1594_s0 + $0x8] sm:$0xff] }
   0x2   :  { %120 = vmatpush.msra.mxu0 %v83_v0  ;;  %v79_v2 = vld [vmem:[%s1593_s1 + $0xd0] sm:$0xff]  ;;  %v105_v3 = vld [vmem:[%s1593_s1 + $0x1a0] sm:$0xff]  ;;  %v970_v26 = vld [vmem:[%s1595_s4 + $0x78] sm:$0xff] }
   0x3   :  { %v103_v4 = vld [vmem:[%s1593_s1 + $0x190] sm:$0xff]  ;;  %154 = vmatpush.msra.mxu1 %v105_v3  ;;  %v77_v5 = vld [vmem:[%s1593_s1 + $0xc0] sm:$0xff]  ;;  %v984_v29 = vld [vmem:[%s1595_s4 + $0x68] sm:$0xff] }
   0x4   :  { %121 = vmatpush.msra.mxu0 %v81_v1  ;;  %v101_v6 = vld [vmem:[%s1593_s1 + $0x180] sm:$0xff]  ;;  %v75_v7 = vld [vmem:[%s1593_s1 + $0xb0] sm:$0xff]  ;;  %v1003_v33 = vld [vmem:[%s1594_s0 + $0x18] sm:$0xff] }
   0x5   :  { %155 = vmatpush.msra.mxu1 %v103_v4  ;;  %v99_v8 = vld [vmem:[%s1593_s1 + $0x170] sm:$0xff]  ;;  %v73_v9 = vld [vmem:[%s1593_s1 + $0xa0] sm:$0xff]  ;;  %v1009_v34 = vld [vmem:[%s1595_s4 + $0x58] sm:$0xff] }
   0x6   :  { %122 = vmatpush.msra.mxu0 %v79_v2  ;;  %v97_v10 = vld [vmem:[%s1593_s1 + $0x160] sm:$0xff]  ;;  %v71_v11 = vld [vmem:[%s1593_s1 + $0x90] sm:$0xff]  ;;  %v1024_v36 = vld [vmem:[%s1595_s4 + $0x48] sm:$0xff] }
   0x7   :  { %156 = vmatpush.msra.mxu1 %v101_v6  ;;  %v95_v12 = vld [vmem:[%s1593_s1 + $0x150] sm:$0xff]  ;;  %v69_v13 = vld [vmem:[%s1593_s1 + $0x80] sm:$0xff]  ;;  %v1040_v39 = vld [vmem:[%s1594_s0 + $0x28] sm:$0xff] }
   0x8   :  { %123 = vmatpush.msra.mxu0 %v77_v5  ;;  %v93_v14 = vld [vmem:[%s1593_s1 + $0x140] sm:$0xff]  ;;  %v67_v15 = vld [vmem:[%s1593_s1 + $0x70] sm:$0xff]  ;;  %v1046_v40 = vld [vmem:[%s1595_s4 + $0x38] sm:$0xff] }
   0x9   :  { %157 = vmatpush.msra.mxu1 %v99_v8  ;;  %v91_v16 = vld [vmem:[%s1593_s1 + $0x130] sm:$0xff]  ;;  %v65_v17 = vld [vmem:[%s1593_s1 + $0x60] sm:$0xff]  ;;  %v1061_v42 = vld [vmem:[%s1595_s4 + $0x28] sm:$0xff] }
   0xa   :  { %124 = vmatpush.msra.mxu0 %v75_v7  ;;  %v89_v18 = vld [vmem:[%s1593_s1 + $0x120] sm:$0xff]  ;;  %v63_v19 = vld [vmem:[%s1593_s1 + $0x50] sm:$0xff]  ;;  %v1077_v45 = vld [vmem:[%s1594_s0 + $0x38] sm:$0xff] }
   0xb   :  { %158 = vmatpush.msra.mxu1 %v97_v10  ;;  %v87_v20 = vld [vmem:[%s1593_s1 + $0x110] sm:$0xff]  ;;  %v61_v21 = vld [vmem:[%s1593_s1 + $0x40] sm:$0xff]  ;;  %v1083_v46 = vld [vmem:[%s1595_s4 + $0x18] sm:$0xff] }
   0xc   :  { %125 = vmatpush.msra.mxu0 %v73_v9  ;;  %v85_v22 = vld [vmem:[%s1593_s1 + $0x100] sm:$0xff]  ;;  %v59_v24 = vld [vmem:[%s1593_s1 + $0x30] sm:$0xff]  ;;  %v1105_v49 = vld [vmem:[%s1595_s4 + $0x8] sm:$0xff] }
   0xd   :  { %159 = vmatpush.msra.mxu1 %v95_v12  ;;  %v57_v25 = vld [vmem:[%s1593_s1 + $0x20] sm:$0xff]  ;;  %v975_v27 = vld [vmem:[%s1595_s4 + $0x70] sm:$0xff]  ;;  %v84_v52 = vld [vmem:[%s1593_s1 + $0xf8] sm:$0xff] }
   0xe   :  { %126 = vmatpush.msra.mxu0 %v71_v11  ;;  %v55_v28 = vld [vmem:[%s1593_s1 + $0x10] sm:$0xff]  ;;  %v53_v30 = vld [vmem:[%s1593_s1] sm:$0xff]  ;;  %v82_v53 = vld [vmem:[%s1593_s1 + $0xe8] sm:$0xff]  ;;  %178 = vmatpush.msra.mxu2 %v84_v52 }
   0xf   :  { %160 = vmatpush.msra.mxu1 %v93_v14  ;;  %v993_v31 = vld [vmem:[%s1595_s4 + $0x60] sm:$0xff]  ;;  %v1018_v35 = vld [vmem:[%s1595_s4 + $0x50] sm:$0xff]  ;;  %v80_v54 = vld [vmem:[%s1593_s1 + $0xd8] sm:$0xff] }
  0x10   :  { %127 = vmatpush.msra.mxu0 %v69_v13  ;;  %v998_v32 = vld [vmem:[%s1594_s0] sm:$0xff]  ;;  %v1035_v38 = vld [vmem:[%s1594_s0 + $0x10] sm:$0xff]  ;;  %v106_v55 = vld [vmem:[%s1593_s1 + $0x1a8] sm:$0xff]  ;;  %179 = vmatpush.msra.mxu2 %v82_v53 }
  0x11   :  { %161 = vmatpush.msra.mxu1 %v91_v16  ;;  %v1030_v37 = vld [vmem:[%s1595_s4 + $0x40] sm:$0xff]  ;;  %v1055_v41 = vld [vmem:[%s1595_s4 + $0x30] sm:$0xff]  ;;  %v104_v56 = vld [vmem:[%s1593_s1 + $0x198] sm:$0xff]  ;;  %212 = vmatpush.msra.mxu3 %v106_v55 }
  0x12   :  { %128 = vmatpush.msra.mxu0 %v67_v15  ;;  %v1067_v43 = vld [vmem:[%s1595_s4 + $0x20] sm:$0xff]  ;;  %v1092_v47 = vld [vmem:[%s1595_s4 + $0x10] sm:$0xff]  ;;  %v78_v57 = vld [vmem:[%s1593_s1 + $0xc8] sm:$0xff]  ;;  %180 = vmatpush.msra.mxu2 %v80_v54 }
  0x13   :  { %162 = vmatpush.msra.mxu1 %v89_v18  ;;  %v1072_v44 = vld [vmem:[%s1594_s0 + $0x20] sm:$0xff]  ;;  %v1099_v48 = vld [vmem:[%s1594_s0 + $0x30] sm:$0xff]  ;;  %v102_v58 = vld [vmem:[%s1593_s1 + $0x188] sm:$0xff]  ;;  %213 = vmatpush.msra.mxu3 %v104_v56 }
  0x14   :  { %129 = vmatpush.msra.mxu0 %v65_v17  ;;  %v1111_v50 = vld [vmem:[%s1595_s4] sm:$0xff]  ;;  %v76_v61 = vld [vmem:[%s1593_s1 + $0xb8] sm:$0xff]  ;;  %181 = vmatpush.msra.mxu2 %v78_v57  ;;  %v74_v0 = vld [vmem:[%s1593_s1 + $0xa8] sm:$0xff] }
  0x15   :  { %163 = vmatpush.msra.mxu1 %v87_v20  ;;  %v100_v62 = vld [vmem:[%s1593_s1 + $0x178] sm:$0xff]  ;;  %214 = vmatpush.msra.mxu3 %v102_v58  ;;  %v98_v1 = vld [vmem:[%s1593_s1 + $0x168] sm:$0xff] }
  0x16   :  { %130 = vmatpush.msra.mxu0 %v63_v19  ;;  %182 = vmatpush.msra.mxu2 %v76_v61  ;;  %v72_v2 = vld [vmem:[%s1593_s1 + $0x98] sm:$0xff]  ;;  %v70_v4 = vld [vmem:[%s1593_s1 + $0x88] sm:$0xff] }
  0x17   :  { %164 = vmatpush.msra.mxu1 %v85_v22  ;;  %215 = vmatpush.msra.mxu3 %v100_v62  ;;  %v96_v3 = vld [vmem:[%s1593_s1 + $0x158] sm:$0xff]  ;;  %v66_v8 = vld [vmem:[%s1593_s1 + $0x68] sm:$0xff] }
  0x18   :  { %131 = vmatpush.msra.mxu0 %v61_v21  ;;  %803 = vmatmul.msk.f32.vlgmr.msra.gmra.mxu1 %vm107_vm0, %v957_v23  ;;  %v68_v7 = vld [vmem:[%s1593_s1 + $0x78] sm:$0xff]  ;;  %v62_v16 = vld [vmem:[%s1593_s1 + $0x48] sm:$0xff] }
  0x19   :  { %236 = vmatpush.msrb.mxu1 %v970_v26  ;;  %183 = vmatpush.msra.mxu2 %v74_v0  ;;  %v64_v10 = vld [vmem:[%s1593_s1 + $0x58] sm:$0xff]  ;;  %v94_v17 = vld [vmem:[%s1593_s1 + $0x148] sm:$0xff] }
  0x1a   :  { %132 = vmatpush.msra.mxu0 %v59_v24  ;;  %216 = vmatpush.msra.mxu3 %v98_v1  ;;  %v60_v18 = vld [vmem:[%s1593_s1 + $0x38] sm:$0xff]  ;;  %v58_v20 = vld [vmem:[%s1593_s1 + $0x28] sm:$0xff] }
  0x1b   :  { %237 = vmatpush.msrb.mxu1 %v975_v27  ;;  %184 = vmatpush.msra.mxu2 %v72_v2  ;;  %v92_v19 = vld [vmem:[%s1593_s1 + $0x138] sm:$0xff]  ;;  %v90_v21 = vld [vmem:[%s1593_s1 + $0x128] sm:$0xff] }
  0x1c   :  { %133 = vmatpush.msra.mxu0 %v57_v25  ;;  %217 = vmatpush.msra.mxu3 %v96_v3  ;;  %v56_v22 = vld [vmem:[%s1593_s1 + $0x18] sm:$0xff]  ;;  %v54_v25 = vld [vmem:[%s1593_s1 + $0x8] sm:$0xff] }
  0x1d   :  { %238 = vmatpush.msrb.mxu1 %v984_v29  ;;  %185 = vmatpush.msra.mxu2 %v70_v4  ;;  %v88_v24 = vld [vmem:[%s1593_s1 + $0x118] sm:$0xff] }
  0x1e   :  { %134 = vmatpush.msra.mxu0 %v55_v28  ;;  %218 = vmatpush.msra.mxu3 %v94_v17  ;;  %v86_v28 = vld [vmem:[%s1593_s1 + $0x108] sm:$0xff]  ;;  %v454_v4 = vld [vmem:[%s1596_s2 + $0xf8] sm:$0xff] }
  0x1f   :  { %239 = vmatpush.msrb.mxu1 %v993_v31  ;;  %186 = vmatpush.msra.mxu2 %v68_v7  ;;  %v444_v17 = vld [vmem:[%s1596_s2 + $0xa8] sm:$0xff] }
  0x20   :  { %135 = vmatpush.msra.mxu0 %v53_v30  ;;  %804 = vmatmul.msk.f32.gmra.mxu1 %vm107_vm0, %v1003_v33 }
  0x21   :  { %136 = vmatmul.f32.vlgmr.msra.gmra.mxu0 %v998_v32  ;;  %240 = vmatpush.msrb.mxu1 %v1009_v34 }
  0x22   :  { %187 = vmatpush.msra.mxu2 %v66_v8  ;;  %219 = vmatpush.msra.mxu3 %v92_v19  ;;  %v451_v8 = vld [vmem:[%s1596_s2 + $0xe0] sm:$0xff] }
  0x23   :  { %241 = vmatpush.msrb.mxu1 %v1018_v35  ;;  %v443_v19 = vld [vmem:[%s1596_s2 + $0xa0] sm:$0xff] }
  0x24   :  { %188 = vmatpush.msra.mxu2 %v64_v10  ;;  %220 = vmatpush.msra.mxu3 %v90_v21  ;;  %v449_v10 = vld [vmem:[%s1596_s2 + $0xd0] sm:$0xff] }
  0x25   :  { %242 = vmatpush.msrb.mxu1 %v1024_v36 }
  0x26   :  { %189 = vmatpush.msra.mxu2 %v62_v16  ;;  %221 = vmatpush.msra.mxu3 %v88_v24  ;;  %v445_v16 = vld [vmem:[%s1596_s2 + $0xb0] sm:$0xff] }
  0x27   :  { %243 = vmatpush.msrb.mxu1 %v1030_v37 }
  0x28   :  { %805 = vmatmul.msk.f32.gmra.mxu1 %vm107_vm0, %v1040_v39  ;;  %190 = vmatpush.msra.mxu2 %v60_v18 }
  0x29   :  { %139 = vmatmul.f32.gmra.mxu0 %v1035_v38  ;;  %244 = vmatpush.msrb.mxu1 %v1046_v40 }
  0x2a   :  { %191 = vmatpush.msra.mxu2 %v58_v20  ;;  %222 = vmatpush.msra.mxu3 %v86_v28 }
  0x2b   :  { %245 = vmatpush.msrb.mxu1 %v1055_v41  ;;  %807 = vmatmul.msk.f32.vlgmr.msra.gmra.mxu3 %vm107_vm0, %v957_v23 }
  0x2c   :  { %192 = vmatpush.msra.mxu2 %v56_v22  ;;  %282 = vmatpush.msrb.mxu3 %v970_v26  ;;  %v442_v22 = vld [vmem:[%s1596_s2 + $0x98] sm:$0xff] }
  0x2d   :  { %246 = vmatpush.msrb.mxu1 %v1061_v42 }
  0x2e   :  { %193 = vmatpush.msra.mxu2 %v54_v25  ;;  %283 = vmatpush.msrb.mxu3 %v975_v27  ;;  %v441_v25 = vld [vmem:[%s1596_s2 + $0x90] sm:$0xff] }
  0x2f   :  { %247 = vmatpush.msrb.mxu1 %v1067_v43  ;;  %194 = vmatmul.f32.vlgmr.msra.gmra.mxu2 %v998_v32 }
  0x30   :  { %806 = vmatmul.msk.f32.gmra.mxu1 %vm107_vm0, %v1077_v45  ;;  %284 = vmatpush.msrb.mxu3 %v984_v29 }
  0x31   :  { %142 = vmatmul.f32.gmra.mxu0 %v1072_v44  ;;  %248 = vmatpush.msrb.mxu1 %v1083_v46 }
  0x32   :  { %285 = vmatpush.msrb.mxu3 %v993_v31 }
  0x33   :  { %249 = vmatpush.msrb.mxu1 %v1092_v47  ;;  %808 = vmatmul.msk.f32.gmra.mxu3 %vm107_vm0, %v1003_v33 }
  0x34   :  { %286 = vmatpush.msrb.mxu3 %v1009_v34 }
  0x35   :  { %250 = vmatpush.msrb.mxu1 %v1105_v49 }
  0x36   :  { %287 = vmatpush.msrb.mxu3 %v1018_v35 }
  0x37   :  { %251 = vmatpush.msrb.mxu1 %v1111_v50  ;;  %197 = vmatmul.f32.gmra.mxu2 %v1035_v38 }
  0x38   :  { %288 = vmatpush.msrb.mxu3 %v1024_v36 }
  0x39   :  { %145 = vmatmul.f32.gmra.mxu0 %v1099_v48  ;;  %500 = vmatpush.msra.mxu1 %v454_v4 }
  0x3a   :  { %289 = vmatpush.msrb.mxu3 %v1030_v37 }
  0x3b   :  { %809 = vmatmul.msk.f32.gmra.mxu3 %vm107_vm0, %v1040_v39 }
  0x3c   :  { %290 = vmatpush.msrb.mxu3 %v1046_v40 }
  0x3e   :  { %291 = vmatpush.msrb.mxu3 %v1055_v41 }
  0x3f   :  { %200 = vmatmul.f32.gmra.mxu2 %v1072_v44 }
  0x40   :  { %292 = vmatpush.msrb.mxu3 %v1061_v42 }
  0x42   :  { %293 = vmatpush.msrb.mxu3 %v1067_v43 }
  0x43   :  { %810 = vmatmul.msk.f32.gmra.mxu3 %vm107_vm0, %v1077_v45 }
  0x44   :  { %294 = vmatpush.msrb.mxu3 %v1083_v46 }
  0x46   :  { %295 = vmatpush.msrb.mxu3 %v1092_v47 }
  0x47   :  { %203 = vmatmul.f32.gmra.mxu2 %v1099_v48 }
  0x48   :  { %296 = vmatpush.msrb.mxu3 %v1105_v49 }
  0x4a   :  { %297 = vmatpush.msrb.mxu3 %v1111_v50 }
  0x95   :  { %v166_v51 = vpop.f32.mrf.mxu1 }
  0x9d   :  { %v169_v63 = vpop.f32.mrf.mxu1 }
  0x9e   :  { %v137_v59 = vpop.f32.mrf.mxu0 }
  0x9f   :  { %v1135_v60 = vadd.f32 %v166_v51, %v137_v59 }
  0xa1   :  { %252 = vmatmul.f32.vlgmr.msrb.gmra.mxu1 %v1135_v60 }
  0xa5   :  { %v172_v9 = vpop.f32.mrf.mxu1 }
  0xa6   :  { %v140_v5 = vpop.f32.mrf.mxu0 }
  0xa7   :  { %v1159_v6 = vadd.f32 %v169_v63, %v140_v5  ;;  %v453_v5 = vld [vmem:[%s1596_s2 + $0xf0] sm:$0xff] }
  0xa8   :  { %501 = vmatpush.msra.mxu1 %v453_v5 }
  0xa9   :  { %255 = vmatmul.f32.gmra.mxu1 %v1159_v6 }
  0xad   :  { %v175_v13 = vpop.f32.mrf.mxu1 }
  0xae   :  { %v143_v11 = vpop.f32.mrf.mxu0  ;;  %v1255_v63 = vpop.f32.mrf.mxu3 }
  0xaf   :  { %v1171_v12 = vadd.f32 %v172_v9, %v143_v11  ;;  %v450_v9 = vld [vmem:[%s1596_s2 + $0xd8] sm:$0xff]  ;;  %v448_v11 = vld [vmem:[%s1596_s2 + $0xc8] sm:$0xff] }
  0xb1   :  { %258 = vmatmul.f32.gmra.mxu1 %v1171_v12 }
  0xb6   :  { %v146_v14 = vpop.f32.mrf.mxu0  ;;  %v1257_v0 = vpop.f32.mrf.mxu3 }
  0xb7   :  { %v1174_v15 = vadd.f32 %v175_v13, %v146_v14  ;;  %v447_v13 = vld [vmem:[%s1596_s2 + $0xc0] sm:$0xff]  ;;  %v446_v14 = vld [vmem:[%s1596_s2 + $0xb8] sm:$0xff] }
  0xb9   :  { %261 = vmatmul.f32.gmra.mxu1 %v1174_v15 }
  0xbe   :  { %v1259_v1 = vpop.f32.mrf.mxu3 }
  0xc6   :  { %v1261_v2 = vpop.f32.mrf.mxu3 }
 0x11e   :  { %v253_v23 = vpop.f32.mrf.mxu1 }
 0x126   :  { %v256_v30 = vpop.f32.mrf.mxu1 }
 0x127   :  { %v265_v33 = vadd.f32 %v256_v30, %v253_v23  ;;  %v440_v23 = vld [vmem:[%s1596_s2 + $0x88] sm:$0xff] }
 0x12e   :  { %v259_v32 = vpop.f32.mrf.mxu1 }
 0x12f   :  { %v266_v38 = vadd.f32 %v265_v33, %v259_v32  ;;  %v439_v32 = vld [vmem:[%s1596_s2 + $0x80] sm:$0xff] }
 0x136   :  { %v262_v39 = vpop.f32.mrf.mxu1 }
 0x137   :  { %v267_v44 = vadd.f32 %v266_v38, %v262_v39 }
 0x139   :  { %v268_v51 = vrot.slane %v267_v44, 4 }
 0x13b   :  { %v269_v52 = vadd.f32 %v268_v51, %v267_v44 }
 0x13d   :  { %v270_v48 = vrot.slane %v269_v52, 2 }
 0x13f   :  { %v271_v53 = vadd.f32 %v270_v48, %v269_v52 }
 0x141   :  { %v272_v54 = vrot.slane %v271_v53, 1 }
 0x143   :  { %v273_v45 = vadd.f32 %v272_v54, %v271_v53 }
 0x145   :  { %v1236_v55 = vsub.f32 %v1135_v60, %v273_v45  ;;  %v1241_v57 = vsub.f32 %v1159_v6, %v273_v45  ;;  %v1246_v59 = vsub.f32 %v1171_v12, %v273_v45  ;;  %v1251_v60 = vsub.f32 %v1174_v15, %v273_v45  ;;  %v452_v6 = vld [vmem:[%s1596_s2 + $0xe8] sm:$0xff]  ;;  %v1324_v45 = vld [vmem:[%s1597_s5] sm:$0x3f] }
 0x146   :  { %502 = vmatpush.msra.mxu1 %v452_v6 }
 0x147   :  { %v278_v56 = vmul.f32 %v1236_v55, %v1236_v55  ;;  %v279_v58 = vmul.f32 %v1241_v57, %v1241_v57  ;;  %v280_v61 = vmul.f32 %v1246_v59, %v1246_v59  ;;  %v281_v62 = vmul.f32 %v1251_v60, %v1251_v60 }
 0x148   :  { %503 = vmatpush.msra.mxu1 %v451_v8 }
 0x149   :  { %298 = vmatmul.f32.vlgmr.msrb.gmra.mxu3 %v278_v56 }
 0x14a   :  { %504 = vmatpush.msra.mxu1 %v450_v9 }
 0x14c   :  { %505 = vmatpush.msra.mxu1 %v449_v10 }
 0x14e   :  { %506 = vmatpush.msra.mxu1 %v448_v11 }
 0x150   :  { %507 = vmatpush.msra.mxu1 %v447_v13 }
 0x151   :  { %301 = vmatmul.f32.gmra.mxu3 %v279_v58  ;;  %v335_v58 = vperm.slane %v1324_v45, 0 }
 0x152   :  { %508 = vmatpush.msra.mxu1 %v446_v14 }
 0x154   :  { %509 = vmatpush.msra.mxu1 %v445_v16  ;;  %v350_v16 = vld [vmem:[%s1598_s3 + $0x8] sm:$0xff] }
 0x156   :  { %510 = vmatpush.msra.mxu1 %v444_v17  ;;  %v351_v17 = vld [vmem:[%s1598_s3 + $0x10] sm:$0xff] }
 0x158   :  { %511 = vmatpush.msra.mxu1 %v443_v19  ;;  %v438_v19 = vld [vmem:[%s1596_s2 + $0x78] sm:$0xff] }
 0x159   :  { %304 = vmatmul.f32.gmra.mxu3 %v280_v61  ;;  %471 = vmatpush.msrb.mxu2 %v438_v19 }
 0x15a   :  { %512 = vmatpush.msra.mxu1 %v442_v22  ;;  %v435_v22 = vld [vmem:[%s1596_s2 + $0x60] sm:$0xff] }
 0x15c   :  { %513 = vmatpush.msra.mxu1 %v441_v25  ;;  %v434_v25 = vld [vmem:[%s1596_s2 + $0x58] sm:$0xff] }
 0x15e   :  { %514 = vmatpush.msra.mxu1 %v440_v23  ;;  %v432_v23 = vld [vmem:[%s1596_s2 + $0x48] sm:$0xff] }
 0x160   :  { %515 = vmatpush.msra.mxu1 %v439_v32  ;;  %v354_v32 = vld [vmem:[%s1598_s3 + $0x28] sm:$0xff] }
 0x161   :  { %307 = vmatmul.f32.gmra.mxu3 %v281_v62  ;;  %v340_v62 = vperm.slane %v1324_v45, 1 }
 0x162   :  { %604 = vmatpush.msrb.mxu1 %v970_v26 }
 0x164   :  { %605 = vmatpush.msrb.mxu1 %v975_v27 }
 0x166   :  { %606 = vmatpush.msrb.mxu1 %v984_v29 }
 0x168   :  { %607 = vmatpush.msrb.mxu1 %v993_v31 }
 0x16a   :  { %608 = vmatpush.msrb.mxu1 %v1009_v34 }
 0x16c   :  { %609 = vmatpush.msrb.mxu1 %v1018_v35 }
 0x16e   :  { %610 = vmatpush.msrb.mxu1 %v1024_v36 }
 0x170   :  { %611 = vmatpush.msrb.mxu1 %v1030_v37 }
 0x172   :  { %612 = vmatpush.msrb.mxu1 %v1046_v40 }
 0x174   :  { %613 = vmatpush.msrb.mxu1 %v1055_v41 }
 0x176   :  { %614 = vmatpush.msrb.mxu1 %v1061_v42 }
 0x178   :  { %615 = vmatpush.msrb.mxu1 %v1067_v43 }
 0x17a   :  { %616 = vmatpush.msrb.mxu1 %v1083_v46 }
 0x17c   :  { %617 = vmatpush.msrb.mxu1 %v1092_v47 }
 0x17e   :  { %618 = vmatpush.msrb.mxu1 %v1105_v49 }
 0x180   :  { %619 = vmatpush.msrb.mxu1 %v1111_v50 }
 0x1cc   :  { %v299_v3 = vpop.f32.mrf.mxu3 }
 0x1d4   :  { %v302_v7 = vpop.f32.mrf.mxu3 }
 0x1d5   :  { %v311_v15 = vadd.f32 %v302_v7, %v299_v3 }
 0x1dc   :  { %v305_v12 = vpop.f32.mrf.mxu3 }
 0x1dd   :  { %v312_v18 = vadd.f32 %v311_v15, %v305_v12  ;;  %v349_v15 = vld [vmem:[%s1598_s3] sm:$0xff] }
 0x1e4   :  { %v308_v20 = vpop.f32.mrf.mxu3 }
 0x1e5   :  { %v313_v21 = vadd.f32 %v312_v18, %v308_v20  ;;  %v352_v18 = vld [vmem:[%s1598_s3 + $0x18] sm:$0xff]  ;;  %v437_v20 = vld [vmem:[%s1596_s2 + $0x70] sm:$0xff] }
 0x1e6   :  { %472 = vmatpush.msrb.mxu2 %v437_v20 }
 0x1e7   :  { %v314_v24 = vrot.slane %v313_v21, 4 }
 0x1e9   :  { %v315_v28 = vadd.f32 %v314_v24, %v313_v21  ;;  %v436_v21 = vld [vmem:[%s1596_s2 + $0x68] sm:$0xff]  ;;  %v353_v24 = vld [vmem:[%s1598_s3 + $0x20] sm:$0xff] }
 0x1ea   :  { %473 = vmatpush.msrb.mxu2 %v436_v21 }
 0x1eb   :  { %v316_v30 = vrot.slane %v315_v28, 2 }
 0x1ec   :  { %474 = vmatpush.msrb.mxu2 %v435_v22 }
 0x1ed   :  { %v317_v33 = vadd.f32 %v316_v30, %v315_v28  ;;  %v433_v28 = vld [vmem:[%s1596_s2 + $0x50] sm:$0xff]  ;;  %v431_v30 = vld [vmem:[%s1596_s2 + $0x40] sm:$0xff] }
 0x1ee   :  { %475 = vmatpush.msrb.mxu2 %v434_v25 }
 0x1ef   :  { %v318_v38 = vrot.slane %v317_v33, 1 }
 0x1f0   :  { %476 = vmatpush.msrb.mxu2 %v433_v28 }
 0x1f1   :  { %v319_v39 = vadd.f32 %v318_v38, %v317_v33  ;;  %v430_v33 = vld [vmem:[%s1596_s2 + $0x38] sm:$0xff]  ;;  %v429_v38 = vld [vmem:[%s1596_s2 + $0x30] sm:$0xff] }
 0x1f2   :  { %477 = vmatpush.msrb.mxu2 %v432_v23 }
 0x1f3   :  { %v320_v44 = vadd.f32 1e-05, %v319_v39  ;;  %v428_v39 = vld [vmem:[%s1596_s2 + $0x28] sm:$0xff] }
 0x1f4   :  { %478 = vmatpush.msrb.mxu2 %v431_v30 }
 0x1f5   :  { %838 = vrsqrt.f32 %v320_v44  ;;  %vm327_vm2 = vweird.f32 %v320_v44 }
 0x1f6   :  { %479 = vmatpush.msrb.mxu2 %v430_v33 }
 0x1f8   :  { %480 = vmatpush.msrb.mxu2 %v429_v38 }
 0x1fa   :  { %481 = vmatpush.msrb.mxu2 %v428_v39 }
 0x1fb   :  { %v839_v51 = vpop.eup %838 }
 0x1fc   :  { %v322_v52 = vmul.f32 %v839_v51, %v320_v44  ;;  %vm328_vm1 = vweird.f32 %v839_v51  ;;  %v427_v44 = vld [vmem:[%s1596_s2 + $0x20] sm:$0xff] }
 0x1fd   :  { %vm329_vm3 = vmor %vm327_vm2, %vm328_vm1  ;;  %482 = vmatpush.msrb.mxu2 %v427_v44 }
 0x1fe   :  { %v323_v48 = vmul.f32 %v839_v51, %v322_v52  ;;  %v356_v52 = vld [vmem:[%s1598_s3 + $0x38] sm:$0xff] }
 0x200   :  { %v324_v53 = vmul.f32 0.5, %v323_v48  ;;  %v426_v48 = vld [vmem:[%s1596_s2 + $0x18] sm:$0xff] }
 0x201   :  { %483 = vmatpush.msrb.mxu2 %v426_v48 }
 0x202   :  { %v325_v54 = vsub.f32 1.5, %v324_v53  ;;  %v425_v53 = vld [vmem:[%s1596_s2 + $0x10] sm:$0xff] }
 0x203   :  { %484 = vmatpush.msrb.mxu2 %v425_v53 }
 0x204   :  { %v326_v56 = vmul.f32 %v839_v51, %v325_v54  ;;  %v424_v54 = vld [vmem:[%s1596_s2 + $0x8] sm:$0xff] }
 0x205   :  { %485 = vmatpush.msrb.mxu2 %v424_v54 }
 0x206   :  { %v330_v61 = vsel %vm329_vm3, %v839_v51, %v326_v56  ;;  %v355_v51 = vld [vmem:[%s1598_s3 + $0x30] sm:$0xff]  ;;  %v423_v56 = vld [vmem:[%s1596_s2] sm:$0xff] }
 0x207   :  { %v334_v3 = vmul.f32 %v330_v61, %v1251_v60  ;;  %v331_v4 = vmul.f32 %v330_v61, %v1236_v55  ;;  %v333_v5 = vmul.f32 %v330_v61, %v1246_v59  ;;  %v332_v6 = vmul.f32 %v330_v61, %v1241_v57  ;;  %486 = vmatpush.msrb.mxu2 %v423_v56  ;;  %v469_v61 = vld [vmem:[%s1596_s2 + $0x170] sm:$0xff] }
 0x209   :  { %v339_v7 = vmul.f32 %v335_v58, %v334_v3  ;;  %v336_v8 = vmul.f32 %v335_v58, %v331_v4  ;;  %v338_v9 = vmul.f32 %v335_v58, %v333_v5  ;;  %v337_v10 = vmul.f32 %v335_v58, %v332_v6  ;;  %v470_v58 = vld [vmem:[%s1596_s2 + $0x178] sm:$0xff]  ;;  %558 = vmatpush.msra.mxu2 %v970_v26  ;;  %v467_v3 = vld [vmem:[%s1596_s2 + $0x160] sm:$0xff]  ;;  %v465_v5 = vld [vmem:[%s1596_s2 + $0x150] sm:$0xff] }
 0x20a   :  { %529 = vmatpush.msra.mxu3 %v470_v58  ;;  %v466_v4 = vld [vmem:[%s1596_s2 + $0x158] sm:$0xff]  ;;  %v464_v6 = vld [vmem:[%s1596_s2 + $0x148] sm:$0xff] }
 0x20b   :  { %v344_v11 = vadd.f32 %v340_v62, %v339_v7  ;;  %v341_v12 = vadd.f32 %v340_v62, %v336_v8  ;;  %v343_v13 = vadd.f32 %v340_v62, %v338_v9  ;;  %v342_v55 = vadd.f32 %v340_v62, %v337_v10  ;;  %v468_v62 = vld [vmem:[%s1596_s2 + $0x168] sm:$0xff]  ;;  %559 = vmatpush.msra.mxu2 %v975_v27  ;;  %v463_v7 = vld [vmem:[%s1596_s2 + $0x140] sm:$0xff]  ;;  %v462_v8 = vld [vmem:[%s1596_s2 + $0x138] sm:$0xff] }
 0x20c   :  { %530 = vmatpush.msra.mxu3 %v469_v61  ;;  %v461_v9 = vld [vmem:[%s1596_s2 + $0x130] sm:$0xff]  ;;  %v460_v10 = vld [vmem:[%s1596_s2 + $0x128] sm:$0xff] }
 0x20d   :  { %v348_v60 = vmax.f32 %v344_v11, 0.0  ;;  %v345_v14 = vmax.f32 %v341_v12, 0.0  ;;  %v347_v57 = vmax.f32 %v343_v13, 0.0  ;;  %v346_v59 = vmax.f32 %v342_v55, 0.0  ;;  %560 = vmatpush.msra.mxu2 %v984_v29  ;;  %v459_v11 = vld [vmem:[%s1596_s2 + $0x120] sm:$0xff]  ;;  %v458_v12 = vld [vmem:[%s1596_s2 + $0x118] sm:$0xff] }
 0x20e   :  { %531 = vmatpush.msra.mxu3 %v468_v62  ;;  %v457_v13 = vld [vmem:[%s1596_s2 + $0x110] sm:$0xff] }
 0x20f   :  { %394 = vmatpush.msrb.mxu0 %v348_v60  ;;  %516 = vmatmul.f32.vlgmr.msra.gmra.mxu1 %v345_v14 }
 0x210   :  { %561 = vmatpush.msra.mxu2 %v993_v31  ;;  %532 = vmatpush.msra.mxu3 %v467_v3 }
 0x211   :  { %395 = vmatpush.msrb.mxu0 %v347_v57 }
 0x212   :  { %562 = vmatpush.msra.mxu2 %v1009_v34  ;;  %533 = vmatpush.msra.mxu3 %v466_v4 }
 0x213   :  { %396 = vmatpush.msrb.mxu0 %v346_v59 }
 0x214   :  { %563 = vmatpush.msra.mxu2 %v1018_v35  ;;  %534 = vmatpush.msra.mxu3 %v465_v5 }
 0x215   :  { %397 = vmatpush.msrb.mxu0 %v345_v14  ;;  %v455_v14 = vld [vmem:[%s1596_s2 + $0x100] sm:$0xff] }
 0x216   :  { %811 = vmatmul.msk.f32.vlgmr.msrb.gmra.mxu0 %vm357_vm4, %v349_v15  ;;  %564 = vmatpush.msra.mxu2 %v1024_v36 }
 0x217   :  { %519 = vmatmul.f32.gmra.mxu1 %v346_v59  ;;  %713 = vmatpush.msra.mxu0 %v970_v26 }
 0x218   :  { %535 = vmatpush.msra.mxu3 %v464_v6  ;;  %565 = vmatpush.msra.mxu2 %v1030_v37 }
 0x219   :  { %714 = vmatpush.msra.mxu0 %v975_v27 }
 0x21a   :  { %536 = vmatpush.msra.mxu3 %v463_v7  ;;  %566 = vmatpush.msra.mxu2 %v1046_v40 }
 0x21b   :  { %715 = vmatpush.msra.mxu0 %v984_v29 }
 0x21c   :  { %537 = vmatpush.msra.mxu3 %v462_v8  ;;  %567 = vmatpush.msra.mxu2 %v1055_v41 }
 0x21d   :  { %716 = vmatpush.msra.mxu0 %v993_v31 }
 0x21e   :  { %812 = vmatmul.msk.f32.gmra.mxu0 %vm357_vm4, %v350_v16  ;;  %538 = vmatpush.msra.mxu3 %v461_v9 }
 0x21f   :  { %522 = vmatmul.f32.gmra.mxu1 %v347_v57  ;;  %717 = vmatpush.msra.mxu0 %v1009_v34 }
 0x220   :  { %568 = vmatpush.msra.mxu2 %v1061_v42  ;;  %539 = vmatpush.msra.mxu3 %v460_v10 }
 0x221   :  { %718 = vmatpush.msra.mxu0 %v1018_v35 }
 0x222   :  { %569 = vmatpush.msra.mxu2 %v1067_v43  ;;  %540 = vmatpush.msra.mxu3 %v459_v11 }
 0x223   :  { %719 = vmatpush.msra.mxu0 %v1024_v36 }
 0x224   :  { %570 = vmatpush.msra.mxu2 %v1083_v46  ;;  %541 = vmatpush.msra.mxu3 %v458_v12 }
 0x225   :  { %720 = vmatpush.msra.mxu0 %v1030_v37 }
 0x226   :  { %813 = vmatmul.msk.f32.gmra.mxu0 %vm357_vm4, %v351_v17  ;;  %571 = vmatpush.msra.mxu2 %v1092_v47 }
 0x227   :  { %525 = vmatmul.f32.gmra.mxu1 %v348_v60  ;;  %721 = vmatpush.msra.mxu0 %v1046_v40  ;;  %v456_v60 = vld [vmem:[%s1596_s2 + $0x108] sm:$0xff] }
 0x228   :  { %542 = vmatpush.msra.mxu3 %v457_v13  ;;  %572 = vmatpush.msra.mxu2 %v1105_v49 }
 0x229   :  { %722 = vmatpush.msra.mxu0 %v1055_v41 }
 0x22a   :  { %543 = vmatpush.msra.mxu3 %v456_v60  ;;  %573 = vmatpush.msra.mxu2 %v1111_v50 }
 0x22b   :  { %723 = vmatpush.msra.mxu0 %v1061_v42 }
 0x22c   :  { %544 = vmatpush.msra.mxu3 %v455_v14 }
 0x22d   :  { %724 = vmatpush.msra.mxu0 %v1067_v43 }
 0x22e   :  { %814 = vmatmul.msk.f32.gmra.mxu0 %vm357_vm4, %v352_v18  ;;  %667 = vmatpush.msrb.mxu3 %v970_v26 }
 0x22f   :  { %725 = vmatpush.msra.mxu0 %v1083_v46 }
 0x230   :  { %668 = vmatpush.msrb.mxu3 %v975_v27 }
 0x231   :  { %726 = vmatpush.msra.mxu0 %v1092_v47 }
 0x232   :  { %669 = vmatpush.msrb.mxu3 %v984_v29 }
 0x233   :  { %727 = vmatpush.msra.mxu0 %v1105_v49 }
 0x234   :  { %670 = vmatpush.msrb.mxu3 %v993_v31 }
 0x235   :  { %728 = vmatpush.msra.mxu0 %v1111_v50 }
 0x236   :  { %815 = vmatmul.msk.f32.gmra.mxu0 %vm357_vm4, %v353_v24  ;;  %671 = vmatpush.msrb.mxu3 %v1009_v34 }
 0x238   :  { %672 = vmatpush.msrb.mxu3 %v1018_v35 }
 0x23a   :  { %673 = vmatpush.msrb.mxu3 %v1024_v36 }
 0x23c   :  { %674 = vmatpush.msrb.mxu3 %v1030_v37 }
 0x23e   :  { %816 = vmatmul.msk.f32.gmra.mxu0 %vm357_vm4, %v354_v32  ;;  %675 = vmatpush.msrb.mxu3 %v1046_v40 }
 0x240   :  { %676 = vmatpush.msrb.mxu3 %v1055_v41 }
 0x242   :  { %677 = vmatpush.msrb.mxu3 %v1061_v42 }
 0x244   :  { %678 = vmatpush.msrb.mxu3 %v1067_v43 }
 0x246   :  { %817 = vmatmul.msk.f32.gmra.mxu0 %vm357_vm4, %v355_v51  ;;  %679 = vmatpush.msrb.mxu3 %v1083_v46 }
 0x248   :  { %680 = vmatpush.msrb.mxu3 %v1092_v47 }
 0x24a   :  { %681 = vmatpush.msrb.mxu3 %v1105_v49 }
 0x24c   :  { %682 = vmatpush.msrb.mxu3 %v1111_v50 }
 0x24e   :  { %818 = vmatmul.msk.f32.gmra.mxu0 %vm357_vm4, %v356_v52 }
 0x293   :  { %v399_v55 = vpop.f32.mrf.mxu0 }
 0x294   :  { %487 = vmatmul.f32.vlgmr.msrb.gmra.mxu2 %v399_v55 }
 0x295   :  { %819 = vmatpush.msrb.mxu2 %v970_v26 }
 0x297   :  { %820 = vmatpush.msrb.mxu2 %v975_v27 }
 0x299   :  { %821 = vmatpush.msrb.mxu2 %v984_v29 }
 0x29b   :  { %v402_v57 = vpop.f32.mrf.mxu0  ;;  %822 = vmatpush.msrb.mxu2 %v993_v31 }
 0x29c   :  { %490 = vmatmul.f32.gmra.mxu2 %v402_v57 }
 0x29d   :  { %823 = vmatpush.msrb.mxu2 %v1009_v34 }
 0x29f   :  { %824 = vmatpush.msrb.mxu2 %v1018_v35  ;;  %v195_v35 = vpop.f32.mrf.mxu2 }
 0x2a1   :  { %825 = vmatpush.msrb.mxu2 %v1024_v36 }
 0x2a3   :  { %v405_v26 = vpop.f32.mrf.mxu0  ;;  %826 = vmatpush.msrb.mxu2 %v1030_v37  ;;  %v225_v37 = vadd.f32 %v1255_v63, %v195_v35 }
 0x2a4   :  { %493 = vmatmul.f32.gmra.mxu2 %v405_v26 }
 0x2a5   :  { %827 = vmatpush.msrb.mxu2 %v1046_v40 }
 0x2a7   :  { %828 = vmatpush.msrb.mxu2 %v1055_v41  ;;  %v198_v40 = vpop.f32.mrf.mxu2 }
 0x2a8   :  { %v228_v41 = vadd.f32 %v1257_v0, %v198_v40 }
 0x2a9   :  { %829 = vmatpush.msrb.mxu2 %v1061_v42 }
 0x2ab   :  { %v408_v27 = vpop.f32.mrf.mxu0  ;;  %830 = vmatpush.msrb.mxu2 %v1067_v43 }
 0x2ac   :  { %496 = vmatmul.f32.gmra.mxu2 %v408_v27 }
 0x2ad   :  { %831 = vmatpush.msrb.mxu2 %v1083_v46 }
 0x2af   :  { %832 = vmatpush.msrb.mxu2 %v1092_v47  ;;  %v201_v42 = vpop.f32.mrf.mxu2 }
 0x2b0   :  { %v231_v43 = vadd.f32 %v1259_v1, %v201_v42 }
 0x2b1   :  { %833 = vmatpush.msrb.mxu2 %v1105_v49 }
 0x2b3   :  { %v411_v29 = vpop.f32.mrf.mxu0  ;;  %834 = vmatpush.msrb.mxu2 %v1111_v50  ;;  %v517_v50 = vpop.f32.mrf.mxu1 }
 0x2b4   :  { %545 = vmatmul.f32.vlgmr.msra.gmra.mxu3 %v411_v29 }
 0x2b7   :  { %v204_v46 = vpop.f32.mrf.mxu2 }
 0x2b8   :  { %v234_v47 = vadd.f32 %v1261_v2, %v204_v46 }
 0x2bb   :  { %v414_v31 = vpop.f32.mrf.mxu0  ;;  %v520_v63 = vpop.f32.mrf.mxu1 }
 0x2bc   :  { %548 = vmatmul.f32.gmra.mxu3 %v414_v31 }
 0x2c3   :  { %v417_v34 = vpop.f32.mrf.mxu0  ;;  %v523_v21 = vpop.f32.mrf.mxu1 }
 0x2c4   :  { %551 = vmatmul.f32.gmra.mxu3 %v417_v34 }
 0x2cb   :  { %v420_v36 = vpop.f32.mrf.mxu0  ;;  %v526_v25 = vpop.f32.mrf.mxu1 }
 0x2cc   :  { %554 = vmatmul.f32.gmra.mxu3 %v420_v36 }
 0x2d4   :  { %683 = vmatmul.f32.vlgmr.msrb.gmra.mxu3 %v225_v37 }
 0x2dc   :  { %686 = vmatmul.f32.gmra.mxu3 %v228_v41 }
 0x2e4   :  { %689 = vmatmul.f32.gmra.mxu3 %v231_v43 }
 0x2ec   :  { %692 = vmatmul.f32.gmra.mxu3 %v234_v47 }
 0x317   :  { %v488_v49 = vpop.f32.mrf.mxu2 }
 0x318   :  { %v518_v59 = vadd.f32 %v517_v50, %v488_v49  ;;  %v844_v50 = vmov 0  }
 0x319   :  { %836 = vset.pattern.permute.xlu0 %v844_v50 }
 0x31f   :  { %v491_v15 = vpop.f32.mrf.mxu2 }
 0x320   :  { %v521_v18 = vadd.f32 %v520_v63, %v491_v15 }
 0x327   :  { %v494_v20 = vpop.f32.mrf.mxu2 }
 0x328   :  { %v524_v1 = vadd.f32 %v523_v21, %v494_v20 }
 0x32f   :  { %v497_v2 = vpop.f32.mrf.mxu2 }
 0x330   :  { %v527_v28 = vadd.f32 %v526_v25, %v497_v2 }
 0x337   :  { %v546_v16 = vpop.f32.mrf.mxu3 }
 0x338   :  { %v547_v17 = vadd.f32 %v546_v16, %v518_v59 }
 0x33a   :  { %574 = vmatmul.f32.vlgmr.msra.gmra.mxu2 %v547_v17 }
 0x33f   :  { %v549_v19 = vpop.f32.mrf.mxu3 }
 0x340   :  { %v550_v0 = vadd.f32 %v549_v19, %v521_v18 }
 0x342   :  { %577 = vmatmul.f32.gmra.mxu2 %v550_v0 }
 0x347   :  { %v552_v22 = vpop.f32.mrf.mxu3 }
 0x348   :  { %v553_v24 = vadd.f32 %v552_v22, %v524_v1 }
 0x34a   :  { %580 = vmatmul.f32.gmra.mxu2 %v553_v24 }
 0x34f   :  { %v555_v23 = vpop.f32.mrf.mxu3 }
 0x350   :  { %v556_v30 = vadd.f32 %v555_v23, %v527_v28 }
 0x352   :  { %583 = vmatmul.f32.gmra.mxu2 %v556_v30 }
 0x357   :  { %v684_v32 = vpop.f32.mrf.mxu3 }
 0x35f   :  { %v687_v33 = vpop.f32.mrf.mxu3 }
 0x360   :  { %v696_v39 = vadd.f32 %v687_v33, %v684_v32 }
 0x367   :  { %v690_v38 = vpop.f32.mrf.mxu3 }
 0x368   :  { %v697_v44 = vadd.f32 %v696_v39, %v690_v38 }
 0x36f   :  { %v693_v51 = vpop.f32.mrf.mxu3 }
 0x370   :  { %v698_v52 = vadd.f32 %v697_v44, %v693_v51 }
 0x372   :  { %v699_v48 = vrot.slane %v698_v52, 4 }
 0x374   :  { %v700_v53 = vadd.f32 %v699_v48, %v698_v52 }
 0x376   :  { %v701_v54 = vrot.slane %v700_v53, 2 }
 0x378   :  { %v702_v56 = vadd.f32 %v701_v54, %v700_v53 }
 0x37a   :  { %v703_v58 = vrot.slane %v702_v56, 1 }
 0x37c   :  { %v704_v61 = vadd.f32 %v703_v58, %v702_v56 }
 0x37e   :  { %v1534_v62 = vsub.f32 %v225_v37, %v704_v61  ;;  %v1536_v3 = vsub.f32 %v228_v41, %v704_v61  ;;  %v1542_v6 = vsub.f32 %v231_v43, %v704_v61  ;;  %v1546_v8 = vsub.f32 %v234_v47, %v704_v61 }
 0x37f   :  { %v12_v47 = vstv %s1599_s6 }
 0x380   :  { %v709_v4 = vmul.f32 %v1534_v62, %v1534_v62  ;;  %v710_v5 = vmul.f32 %v1536_v3, %v1536_v3  ;;  %v711_v7 = vmul.f32 %v1542_v6, %v1542_v6  ;;  %v712_v9 = vmul.f32 %v1546_v8, %v1546_v8  ;;  %13 = vst [vmem:[#allocation2] sm:$0x1] %v12_v47 }
 0x382   :  { %729 = vmatmul.f32.vlgmr.msra.gmra.mxu0 %v709_v4  ;;  %732 = vmatmul.f32.vlgmr.msrb.gmra.mxu2 %v710_v5 }
 0x387   :  { %v837_v49 = vld [vmem:[#allocation2] ss:$0 sm:$0xff] }
 0x388   :  { %784 = vperm.xlu0 %836, %v837_v49  }
 0x38a   :  { %735 = vmatmul.f32.gmra.mxu2 %v711_v7 }
 0x392   :  { %738 = vmatmul.f32.gmra.mxu2 %v712_v9 }
 0x3bd   :  { %v575_v10 = vpop.f32.mrf.mxu2 }
 0x3c5   :  { %v578_v11 = vpop.f32.mrf.mxu2 }
 0x3c6   :  { %v587_v13 = vadd.f32 %v578_v11, %v575_v10 }
 0x3cd   :  { %v581_v12 = vpop.f32.mrf.mxu2 }
 0x3ce   :  { %v588_v60 = vadd.f32 %v587_v13, %v581_v12 }
 0x3d5   :  { %v584_v14 = vpop.f32.mrf.mxu2 }
 0x3d6   :  { %v589_v55 = vadd.f32 %v588_v60, %v584_v14 }
 0x3d8   :  { %v590_v57 = vrot.slane %v589_v55, 4 }
 0x3da   :  { %v591_v26 = vadd.f32 %v590_v57, %v589_v55  ;;  %v657_v55 = vperm.slane %v1324_v45, 2 }
 0x3dc   :  { %v592_v27 = vrot.slane %v591_v26, 2 }
 0x3de   :  { %v593_v29 = vadd.f32 %v592_v27, %v591_v26  ;;  %v766_v26 = vperm.slane %v1324_v45, 4 }
 0x3e0   :  { %v594_v31 = vrot.slane %v593_v29, 1 }
 0x3e2   :  { %v595_v34 = vadd.f32 %v594_v31, %v593_v29  ;;  %v662_v29 = vperm.slane %v1324_v45, 3 }
 0x3e4   :  { %v1550_v35 = vsub.f32 %v547_v17, %v595_v34  ;;  %v1554_v37 = vsub.f32 %v550_v0, %v595_v34  ;;  %v1558_v41 = vsub.f32 %v553_v24, %v595_v34  ;;  %v1562_v43 = vsub.f32 %v556_v30, %v595_v34 }
 0x3e6   :  { %v600_v36 = vmul.f32 %v1550_v35, %v1550_v35  ;;  %v601_v40 = vmul.f32 %v1554_v37, %v1554_v37  ;;  %v602_v42 = vmul.f32 %v1558_v41, %v1558_v41  ;;  %v603_v46 = vmul.f32 %v1562_v43, %v1562_v43 }
 0x3e8   :  { %620 = vmatmul.f32.vlgmr.msrb.gmra.mxu1 %v600_v36 }
 0x3f0   :  { %623 = vmatmul.f32.gmra.mxu1 %v601_v40 }
 0x3f8   :  { %626 = vmatmul.f32.gmra.mxu1 %v602_v42 }
 0x3ff   :  { %v730_v16 = vpop.f32.mrf.mxu0 }
 0x400   :  { %629 = vmatmul.f32.gmra.mxu1 %v603_v46 }
 0x405   :  { %v733_v59 = vpop.f32.mrf.mxu2 }
 0x406   :  { %v742_v17 = vadd.f32 %v733_v59, %v730_v16 }
 0x40d   :  { %v736_v15 = vpop.f32.mrf.mxu2 }
 0x40e   :  { %v743_v18 = vadd.f32 %v742_v17, %v736_v15 }
 0x415   :  { %v739_v63 = vpop.f32.mrf.mxu2 }
 0x416   :  { %v744_v19 = vadd.f32 %v743_v18, %v739_v63 }
 0x418   :  { %v745_v0 = vrot.slane %v744_v19, 4 }
 0x41a   :  { %v746_v21 = vadd.f32 %v745_v0, %v744_v19 }
 0x41c   :  { %v747_v1 = vrot.slane %v746_v21, 2 }
 0x41e   :  { %v748_v24 = vadd.f32 %v747_v1, %v746_v21 }
 0x420   :  { %v749_v2 = vrot.slane %v748_v24, 1 }
 0x422   :  { %v750_v28 = vadd.f32 %v749_v2, %v748_v24 }
 0x424   :  { %v751_v23 = vadd.f32 1e-05, %v750_v28 }
 0x426   :  { %840 = vrsqrt.f32 %v751_v23  ;;  %vm758_vm6 = vweird.f32 %v751_v23 }
 0x42c   :  { %v841_v51 = vpop.eup %840 }
 0x42d   :  { %v753_v53 = vmul.f32 %v841_v51, %v751_v23  ;;  %vm759_vm5 = vweird.f32 %v841_v51 }
 0x42e   :  { %vm760_vm7 = vmor %vm758_vm6, %vm759_vm5 }
 0x42f   :  { %v754_v58 = vmul.f32 %v841_v51, %v753_v53 }
 0x431   :  { %v755_v4 = vmul.f32 0.5, %v754_v58 }
 0x433   :  { %v756_v5 = vsub.f32 1.5, %v755_v4 }
 0x435   :  { %v757_v10 = vmul.f32 %v841_v51, %v756_v5 }
 0x437   :  { %v761_v13 = vsel %vm760_vm7, %v841_v51, %v757_v10 }
 0x438   :  { %v762_v57 = vmul.f32 %v761_v13, %v1534_v62  ;;  %v763_v31 = vmul.f32 %v761_v13, %v1536_v3  ;;  %v764_v34 = vmul.f32 %v761_v13, %v1542_v6  ;;  %v765_v47 = vmul.f32 %v761_v13, %v1546_v8 }
 0x439   :  { %v771_v3 = vperm.slane %v1324_v45, 5 }
 0x43a   :  { %v767_v15 = vmul.f32 %v766_v26, %v762_v57  ;;  %v768_v16 = vmul.f32 %v766_v26, %v763_v31  ;;  %v769_v17 = vmul.f32 %v766_v26, %v764_v34  ;;  %v770_v19 = vmul.f32 %v766_v26, %v765_v47 }
 0x43c   :  { %v772_v8 = vadd.f32 %v771_v3, %v767_v15  ;;  %v773_v21 = vadd.f32 %v771_v3, %v768_v16  ;;  %v774_v1 = vadd.f32 %v771_v3, %v769_v17  ;;  %v775_v28 = vadd.f32 %v771_v3, %v770_v19 }
 0x465   :  { %v621_v20 = vpop.f32.mrf.mxu1 }
 0x46d   :  { %v624_v22 = vpop.f32.mrf.mxu1 }
 0x46e   :  { %v633_v30 = vadd.f32 %v624_v22, %v621_v20 }
 0x475   :  { %v627_v25 = vpop.f32.mrf.mxu1 }
 0x476   :  { %v634_v32 = vadd.f32 %v633_v30, %v627_v25 }
 0x47d   :  { %v630_v33 = vpop.f32.mrf.mxu1 }
 0x47e   :  { %v635_v38 = vadd.f32 %v634_v32, %v630_v33 }
 0x480   :  { %v636_v39 = vrot.slane %v635_v38, 4 }
 0x482   :  { %v637_v44 = vadd.f32 %v636_v39, %v635_v38 }
 0x484   :  { %v638_v52 = vrot.slane %v637_v44, 2 }
 0x486   :  { %v639_v48 = vadd.f32 %v638_v52, %v637_v44 }
 0x488   :  { %v640_v54 = vrot.slane %v639_v48, 1 }
 0x48a   :  { %v641_v56 = vadd.f32 %v640_v54, %v639_v48 }
 0x48c   :  { %v642_v61 = vadd.f32 1e-05, %v641_v56 }
 0x48e   :  { %842 = vrsqrt.f32 %v642_v61  ;;  %vm649_vm9 = vweird.f32 %v642_v61 }
 0x494   :  { %v843_v7 = vpop.eup %842 }
 0x495   :  { %v644_v9 = vmul.f32 %v843_v7, %v642_v61  ;;  %vm650_vm8 = vweird.f32 %v843_v7 }
 0x496   :  { %vm651_vm10 = vmor %vm649_vm9, %vm650_vm8 }
 0x497   :  { %v645_v11 = vmul.f32 %v843_v7, %v644_v9 }
 0x499   :  { %v646_v12 = vmul.f32 0.5, %v645_v11 }
 0x49b   :  { %v647_v60 = vsub.f32 1.5, %v646_v12 }
 0x49d   :  { %v648_v14 = vmul.f32 %v843_v7, %v647_v60 }
 0x49f   :  { %v652_v27 = vsel %vm651_vm10, %v843_v7, %v648_v14 }
 0x4a0   :  { %v653_v36 = vmul.f32 %v652_v27, %v1550_v35  ;;  %v654_v40 = vmul.f32 %v652_v27, %v1554_v37  ;;  %v655_v42 = vmul.f32 %v652_v27, %v1558_v41  ;;  %v656_v46 = vmul.f32 %v652_v27, %v1562_v43  ;;  %v785_v37 = vpop.permute.xlu0 %784 }
 0x4a2   :  { %v658_v62 = vmul.f32 %v657_v55, %v653_v36  ;;  %v659_v49 = vmul.f32 %v657_v55, %v654_v40  ;;  %v660_v50 = vmul.f32 %v657_v55, %v655_v42  ;;  %v661_v59 = vmul.f32 %v657_v55, %v656_v46 }
 0x4a4   :  { %v663_v6 = vadd.f32 %v662_v29, %v658_v62  ;;  %v664_v63 = vadd.f32 %v662_v29, %v659_v49  ;;  %v665_v35 = vadd.f32 %v662_v29, %v660_v50  ;;  %v666_v18 = vadd.f32 %v662_v29, %v661_v59 }
 0x4a6   :  { %v777_v41 = vmax.f32 %v663_v6, 0.0  ;;  %v778_v0 = vmax.f32 %v664_v63, 0.0  ;;  %v779_v43 = vmax.f32 %v665_v35, 0.0  ;;  %v780_v20 = vmax.f32 %v666_v18, 0.0 }
 0x4a8   :  { %v787_v22 = vmul.f32 %v785_v37, %v777_v41  ;;  %v788_v24 = vmul.f32 %v785_v37, %v778_v0  ;;  %v789_v2 = vmul.f32 %v785_v37, %v779_v43  ;;  %v790_v25 = vmul.f32 %v785_v37, %v780_v20 }
 0x4aa   :  { %v791_v23 = vadd.f32 %v787_v22, %v772_v8  ;;  %v792_v45 = vadd.f32 %v788_v24, %v773_v21  ;;  %v793_v30 = vadd.f32 %v789_v2, %v774_v1  ;;  %v794_v32 = vadd.f32 %v790_v25, %v775_v28 }
 0x4ac   :  { %795 = vst [vmem:[%s1600_s7] sm:$0xff] %v791_v23 }
 0x4ad   :  { %796 = vst [vmem:[%s1600_s7 + $0x8] sm:$0xff] %v792_v45 }
 0x4ae   :  { %797 = vst [vmem:[%s1600_s7 + $0x10] sm:$0xff] %v793_v30 }
 0x4af   :  { %798 = vst [vmem:[%s1600_s7 + $0x18] sm:$0xff] %v794_v32 }

</bundles_post_ra>
